<compile_context>
chip_gen: v7x
topology: tpu7x:2x2x1
jax: 0.10.0
libtpu: 0.0.40
codegen_flags: <defaults>
</compile_context>

<pallas_src>
import jax
import jax.numpy as jnp
from jax.experimental import pallas as pl
from jax.experimental.pallas import tpu as pltpu


EPS = 1e-12            # F.normalize default eps
EPS_SQ = EPS * EPS     # rsqrt(max(ss, EPS^2)) == 1 / max(sqrt(ss), EPS)


def _round_up(v, m):
    return (v + m - 1) // m * m


def _vmem_budget_bytes():
    """~75% of per-core VMEM (64 MiB on v7x, 128 MiB on v5e/v6e); conservative if unknown."""
    cap = None
    if hasattr(pltpu, "get_tpu_info"):
        try:
            cap = getattr(pltpu.get_tpu_info(), "vmem_capacity_bytes", None)
        except Exception:  # no TPU visible at trace time -> fall through to the safe default
            cap = None
    if not cap:
        cap = 64 * 1024 * 1024  # v7x per-TensorCore capacity: safe everywhere
    return int(0.75 * cap)


def _integrate_kernel(x_ref, p_ref, gamma_ref, w_ref, b_ref, o_ref, carry_ref):
    """One (batch, seq-tile) grid step.

    x_ref     : (1, TN, D)   residual-stream rows
    p_ref     : (1, TN, D)   previous-thought pause token at the SAME seq position
    gamma_ref : (1, D)       RMSNorm gamma with sqrt(D) pre-folded
    w_ref     : (2D, D)      Linear weight, pre-transposed (z @ w == z @ weight.T)
    b_ref     : (1, D)       Linear bias
    o_ref     : (1, TN, D)   output rows
    carry_ref : (1, D) f32   last pause row of the previous seq tile (the shift carry)
    """
    si = pl.program_id(1)
    tn = x_ref.shape[1]
    d = x_ref.shape[2]

    x = x_ref[0].astype(jnp.float32)        # (TN, D)
    p_cur = p_ref[0].astype(jnp.float32)    # (TN, D)

    # ---- seq shift: output row i must use the pause token of row i-1 ----------------------
    @pl.when(si == 0)
    def _():                                # first seq tile of every batch: previous row is 0
        carry_ref[...] = jnp.zeros_like(carry_ref)
    prev_row = carry_ref[...]               # (1, D) f32

    ids = jax.lax.broadcasted_iota(jnp.int32, (tn, 1), 0)
    # Rotate the tile down by one row on the XLU.  Both rotation directions are computed
    # (the spare rotate rides a free XLU slot) and an iota probe picks, per row, the one
    # that equals "row i-1", so the code does not depend on the rotate-direction convention.
    r_a = pltpu.roll(p_cur, 1, axis=0)
    r_b = pltpu.roll(p_cur, tn - 1, axis=0)
    probe = pltpu.roll(ids, 1, axis=0)
    shifted = jnp.where(probe == ids - 1, r_a, r_b)
    p = jnp.where(ids == 0, prev_row, shifted)                     # (TN, D)
    carry_ref[...] = p_ref[0, tn - 1:tn, :].astype(jnp.float32)    # carry last row forward

    # ---- RMSNorm:  F.normalize(v) * sqrt(d) * gamma   (sqrt(d) pre-folded into gamma) -----
    gamma = gamma_ref[...].astype(jnp.float32)                     # (1, D)
    inv_x = jax.lax.rsqrt(jnp.maximum(jnp.sum(x * x, axis=-1, keepdims=True), EPS_SQ))
    inv_p = jax.lax.rsqrt(jnp.maximum(jnp.sum(p * p, axis=-1, keepdims=True), EPS_SQ))
    xn = x * inv_x * gamma
    pn = p * inv_p * gamma

    # ---- Linear(2d -> d), f32 accumulation -------------------------------------------------
    mm_dtype = w_ref.dtype
    if d % 128 == 0:
        # lane-aligned: one K = 2D matmul fills the 256-wide v6e/v7x MXU
        z = jnp.concatenate([xn.astype(mm_dtype), pn.astype(mm_dtype)], axis=-1)  # (TN, 2D)
        out = jnp.dot(z, w_ref[...], preferred_element_type=jnp.float32)
    else:
        # small / unaligned d: two dots against static ref-slices of the weight
        out = jnp.dot(xn.astype(mm_dtype), w_ref[:d, :], preferred_element_type=jnp.float32)
        out = out + jnp.dot(pn.astype(mm_dtype), w_ref[d:, :], preferred_element_type=jnp.float32)
    out = out + b_ref[...].astype(jnp.float32)
    o_ref[0] = out.astype(o_ref.dtype)


def integrate_previous_thought(x, pause_tokens, gamma, weight, bias, pause_lengths=None,
                               *, tn_max=1024):
    """x: (b, n, d); pause_tokens: (b, n, num_pause, d); weight: (d, 2d) torch layout; bias: (d,)."""
    b, n, d = x.shape
    num_pause = pause_tokens.shape[2]

    # --- previous-thought token source, UNSHIFTED (the kernel applies the seq shift) -------
    if pause_lengths is None and d % 128 == 0:
        # Fully fused: stream pause slot (num_pause-1) straight from pause_tokens; the
        # reshape of the contiguous trailing dims is free (no HBM copy).
        p_src = pause_tokens.reshape(b, n, num_pause * d)
        p_blk = num_pause - 1
    elif pause_lengths is None:
        # d not lane-aligned: a d-wide last-dim block of the reshaped pause_tokens would
        # violate the lane tiling rule, so take the (b, n, d) slice in JAX (still no
        # pad/shift copy -- the shift happens in-kernel).
        p_src = pause_tokens[:, :, -1]
        p_blk = 0
    else:
        # TODO(synk): fuse this data-dependent gather into the kernel via scalar-prefetched
        # per-row pause indices instead of materializing p in HBM.
        idx = pause_lengths[:, :, None, None]
        p_src = jnp.take_along_axis(pause_tokens, idx, axis=2)[:, :, 0]
        p_blk = 0

    # --- parameters (small, grid-invariant) -------------------------------------------------
    # TODO(synk): in a real model, pre-transpose / pre-fold these once at parameter setup
    # time and cache them instead of redoing it per call.
    w_t = weight.T                                                        # (2d, d)
    gamma2 = (gamma.astype(jnp.float32) * (float(d) ** 0.5)).reshape(1, d)
    bias2 = bias.astype(jnp.float32).reshape(1, d)

    # --- row-tile sizing: fill the VMEM budget, no HBM padding copies -----------------------
    itm_x = jnp.dtype(x.dtype).itemsize
    itm_p = jnp.dtype(pause_tokens.dtype).itemsize
    itm_w = jnp.dtype(weight.dtype).itemsize
    pack = max(8, 32 // itm_x)                       # sublane packing: 8 f32 / 16 bf16 / 32 int8
    vmem_budget = _vmem_budget_bytes()
    resident = 2 * (2 * d * d * itm_w) + 4 * (2 * d * 4)      # W + gamma/bias (double-buffered)
    per_row = d * (4 * itm_x + 2 * itm_p) + 10 * d * 4        # x/out + p streams + f32 temps
    avail = vmem_budget - resident
    if avail < pack * per_row:
        # TODO(synk): add a K/N-tiled accumulator path so very large d fits v7x's 64 MiB VMEM.
        raise ValueError(
            f"IntegratePreviousThought Pallas kernel: dim={d} weights do not fit the VMEM "
            f"budget ({vmem_budget} bytes); a d-tiled accumulator variant is required.")
    tn = min(int(avail // per_row), int(tn_max), _round_up(n, pack))
    tn = max(pack, (tn // pack) * pack)

    grid = (b, pl.cdiv(n, tn))
    grid_spec = pltpu.PrefetchScalarGridSpec(
        num_scalar_prefetch=0,
        grid=grid,
        in_specs=[
            pl.BlockSpec((1, tn, d), lambda bi, si: (bi, si, 0)),      # x rows        (streamed)
            pl.BlockSpec((1, tn, d), lambda bi, si: (bi, si, p_blk)),  # pause rows    (streamed)
            pl.BlockSpec((1, d), lambda bi, si: (0, 0)),               # gamma*sqrt(d) (invariant)
            pl.BlockSpec((2 * d, d), lambda bi, si: (0, 0)),           # weight^T      (invariant)
            pl.BlockSpec((1, d), lambda bi, si: (0, 0)),               # bias          (invariant)
        ],
        out_specs=pl.BlockSpec((1, tn, d), lambda bi, si: (bi, si, 0)),
        scratch_shapes=[pltpu.VMEM((1, d), jnp.float32)],              # seq-shift carry row
    )
    return pl.pallas_call(
        _integrate_kernel,
        out_shape=jax.ShapeDtypeStruct((b, n, d), x.dtype),
        grid_spec=grid_spec,
        compiler_params=pltpu.CompilerParams(
            # batch axis can shard across v7x's two TensorCores; the seq axis carries the
            # one-row shift scratch so it must stay sequential.
            dimension_semantics=("parallel", "arbitrary"),
            vmem_limit_bytes=vmem_budget,
        ),
    )(x, p_src, gamma2, w_t, bias2)


def _reference(x, pause_tokens, gamma, weight, bias, pause_lengths=None):
    b, n, d = x.shape
    if pause_lengths is None:
        p = pause_tokens[:, :, -1]
    else:
        idx = pause_lengths[:, :, None, None]
        p = jnp.take_along_axis(pause_tokens, idx, axis=2)[:, :, 0]
    p = jnp.pad(p, ((0, 0), (1, 0), (0, 0)))[:, :n]
    z = jnp.stack((x, p), axis=-2)                                        # (b, n, 2, d)
    norm = jnp.sqrt(jnp.sum(z * z, axis=-1, keepdims=True))
    zn = z / jnp.maximum(norm, EPS) * (d ** 0.5) * gamma
    zc = zn.reshape(b, n, 2 * d)
    return jnp.dot(zc, weight.T, precision=jax.lax.Precision.HIGHEST) + bias


if __name__ == "__main__":
    def _params(key, d):
        k1, k2 = jax.random.split(key)
        gamma = jnp.ones((d,), jnp.float32)
        lim = 1.0 / (2 * d) ** 0.5
        weight = jax.random.uniform(k1, (d, 2 * d), minval=-lim, maxval=lim, dtype=jnp.float32)
        bias = jax.random.uniform(k2, (d,), minval=-lim, maxval=lim, dtype=jnp.float32)
        return gamma, weight, bias

    # both sides accumulate in f32; loose-ish tolerance only covers MXU f32 decomposition noise
    TOL = dict(atol=1e-4, rtol=1e-4)

    # ---- case 1: small d (masked-lane path), default slot + data-dependent gather ----------
    key = jax.random.PRNGKey(0)
    b, n, num_pause, d = 2, 8, 3, 32
    k1, k2, k3, k4 = jax.random.split(key, 4)
    x = jax.random.normal(k1, (b, n, d), jnp.float32)
    pts = jax.random.normal(k2, (b, n, num_pause, d), jnp.float32)
    plens = jax.random.randint(k4, (b, n), 0, num_pause)
    gamma, weight, bias = _params(k3, d)

    out = jax.block_until_ready(integrate_previous_thought(x, pts, gamma, weight, bias))
    assert out.shape == (b, n, d)
    assert jnp.allclose(out, _reference(x, pts, gamma, weight, bias), **TOL)

    out2 = jax.block_until_ready(integrate_previous_thought(x, pts, gamma, weight, bias, plens))
    assert jnp.allclose(out2, _reference(x, pts, gamma, weight, bias, plens), **TOL)

    # ---- case 2: lane-aligned d (fully fused pause read, single K=2d dot) with multiple ----
    # ---- seq tiles, which exercises the in-kernel shift carry across tile boundaries   ----
    b, n, num_pause, d = 2, 16, 3, 128
    k1, k2, k3 = jax.random.split(jax.random.PRNGKey(1), 3)
    x = jax.random.normal(k1, (b, n, d), jnp.float32)
    pts = jax.random.normal(k2, (b, n, num_pause, d), jnp.float32)
    gamma, weight, bias = _params(k3, d)

    out3 = jax.block_until_ready(
        integrate_previous_thought(x, pts, gamma, weight, bias, tn_max=8))
    assert out3.shape == (b, n, d)
    assert jnp.allclose(out3, _reference(x, pts, gamma, weight, bias), **TOL)

    print("KERNEL_OK")
</pallas_src>

<mosaic_0001>
module attributes {stable_mosaic.version = 11 : i64} {
  func.func @_integrate_kernel(%arg0: i32, %arg1: i32, %arg2: memref<1x8x32xf32, #tpu.memory_space<vmem>>, %arg3: memref<1x8x32xf32, #tpu.memory_space<vmem>>, %arg4: memref<1x32xf32, #tpu.memory_space<vmem>>, %arg5: memref<64x32xf32, #tpu.memory_space<vmem>>, %arg6: memref<1x32xf32, #tpu.memory_space<vmem>>, %arg7: memref<1x8x32xf32, #tpu.memory_space<vmem>>, %arg8: memref<1x32xf32, #tpu.memory_space<vmem>>) attributes {dimension_semantics = [#tpu.dimension_semantics<parallel>, #tpu.dimension_semantics<arbitrary>], iteration_bounds = array<i64: 2, 1>, scalar_prefetch = 0 : i64, scratch_operands = 1 : i64, tpu.core_type = #tpu.core_type<tc>, window_params = [{transform_indices = @transform_0, window_bounds = array<i64: 1, 8, 32>}, {transform_indices = @transform_1, window_bounds = array<i64: 1, 8, 32>}, {pipeline_mode = #tpu.pipeline_mode<synchronous>, transform_indices = @transform_2, window_bounds = array<i64: 1, 32>}, {pipeline_mode = #tpu.pipeline_mode<synchronous>, transform_indices = @transform_3, window_bounds = array<i64: 64, 32>}, {pipeline_mode = #tpu.pipeline_mode<synchronous>, transform_indices = @transform_4, window_bounds = array<i64: 1, 32>}, {transform_indices = @transform_5, window_bounds = array<i64: 1, 8, 32>}]} {
    %c0 = arith.constant 0 : index
    %c0_0 = arith.constant 0 : index
    %c0_1 = arith.constant 0 : index
    %0 = vector.load %arg2[%c0, %c0_0, %c0_1] : memref<1x8x32xf32, #tpu.memory_space<vmem>>, vector<1x8x32xf32>
    %1 = vector.shape_cast %0 : vector<1x8x32xf32> to vector<8x32xf32>
    %c0_2 = arith.constant 0 : index
    %c0_3 = arith.constant 0 : index
    %c0_4 = arith.constant 0 : index
    %2 = vector.load %arg3[%c0_2, %c0_3, %c0_4] : memref<1x8x32xf32, #tpu.memory_space<vmem>>, vector<1x8x32xf32>
    %3 = vector.shape_cast %2 : vector<1x8x32xf32> to vector<8x32xf32>
    %c0_i32 = arith.constant 0 : i32
    %4 = arith.cmpi eq, %arg1, %c0_i32 : i32
    %5 = arith.extui %4 : i1 to i32
    %c0_i32_5 = arith.constant 0 : i32
    %6 = arith.cmpi ne, %5, %c0_i32_5 : i32
    scf.if %6 {
      %cst_30 = arith.constant 0.000000e+00 : f32
      %60 = vector.broadcast %cst_30 : f32 to vector<1x32xf32>
      %c0_31 = arith.constant 0 : index
      %c0_32 = arith.constant 0 : index
      %61 = vector.load %arg8[%c0_31, %c0_32] : memref<1x32xf32, #tpu.memory_space<vmem>>, vector<1x32xf32>
      tpu.vector_store %arg8[%c0_31, %c0_32], %60 {strides = array<i32>} : memref<1x32xf32, #tpu.memory_space<vmem>>, vector<1x32xf32>,
    } else {
    }
    %c0_6 = arith.constant 0 : index
    %c0_7 = arith.constant 0 : index
    %7 = vector.load %arg8[%c0_6, %c0_7] : memref<1x32xf32, #tpu.memory_space<vmem>>, vector<1x32xf32>
    %8 = tpu.iota {dimensions = array<i32: 0>} : vector<8x1xi32>
    %c1_i32 = arith.constant 1 : i32
    %9 = tpu.dynamic_rotate %3 by %c1_i32 dim 0 : vector<8x32xf32>, i32 -> vector<8x32xf32>
    %c7_i32 = arith.constant 7 : i32
    %10 = tpu.dynamic_rotate %3 by %c7_i32 dim 0 : vector<8x32xf32>, i32 -> vector<8x32xf32>
    %c1_i32_8 = arith.constant 1 : i32
    %11 = tpu.dynamic_rotate %8 by %c1_i32_8 dim 0 : vector<8x1xi32>, i32 -> vector<8x1xi32>
    %c1_i32_9 = arith.constant 1 : i32
    %12 = vector.broadcast %c1_i32_9 : i32 to vector<8x1xi32>
    %13 = arith.subi %8, %12 : vector<8x1xi32>
    %14 = arith.cmpi eq, %11, %13 : vector<8x1xi32>
    %15 = vector.shape_cast %14 : vector<8x1xi1> to vector<8x1xi1>
    %16 = vector.broadcast %15 : vector<8x1xi1> to vector<8x32xi1>
    %17 = arith.select %16, %9, %10 : vector<8x32xi1>, vector<8x32xf32>
    %c0_i32_10 = arith.constant 0 : i32
    %18 = vector.broadcast %c0_i32_10 : i32 to vector<8x1xi32>
    %19 = arith.cmpi eq, %8, %18 : vector<8x1xi32>
    %20 = vector.shape_cast %19 : vector<8x1xi1> to vector<8x1xi1>
    %21 = vector.broadcast %20 : vector<8x1xi1> to vector<8x32xi1>
    %22 = vector.shape_cast %7 : vector<1x32xf32> to vector<1x32xf32>
    %23 = vector.broadcast %22 : vector<1x32xf32> to vector<8x32xf32>
    %24 = arith.select %21, %23, %17 : vector<8x32xi1>, vector<8x32xf32>
    %c0_11 = arith.constant 0 : index
    %c7 = arith.constant 7 : index
    %c0_12 = arith.constant 0 : index
    %25 = vector.load %arg3[%c0_11, %c7, %c0_12] : memref<1x8x32xf32, #tpu.memory_space<vmem>>, vector<1x1x32xf32>
    %26 = vector.shape_cast %25 : vector<1x1x32xf32> to vector<1x32xf32>
    %c0_13 = arith.constant 0 : index
    %c0_14 = arith.constant 0 : index
    %27 = vector.load %arg8[%c0_13, %c0_14] : memref<1x32xf32, #tpu.memory_space<vmem>>, vector<1x32xf32>
    tpu.vector_store %arg8[%c0_13, %c0_14], %26 {strides = array<i32>} : memref<1x32xf32, #tpu.memory_space<vmem>>, vector<1x32xf32>,
    %c0_15 = arith.constant 0 : index
    %c0_16 = arith.constant 0 : index
    %28 = vector.load %arg4[%c0_15, %c0_16] : memref<1x32xf32, #tpu.memory_space<vmem>>, vector<1x32xf32>
    %29 = arith.mulf %1, %1 : vector<8x32xf32>
    %cst = arith.constant dense<0.000000e+00> : vector<8xf32>
    %30 = vector.multi_reduction <add>, %29, %cst [1] : vector<8x32xf32> to vector<8xf32>
    %31 = vector.shape_cast %30 : vector<8xf32> to vector<8x1xf32>
    %cst_17 = arith.constant 1.000000e-24 : f32
    %32 = vector.broadcast %cst_17 : f32 to vector<8x1xf32>
    %33 = arith.maximumf %31, %32 : vector<8x1xf32>
    %34 = math.rsqrt %33 : vector<8x1xf32>
    %35 = arith.mulf %24, %24 : vector<8x32xf32>
    %cst_18 = arith.constant dense<0.000000e+00> : vector<8xf32>
    %36 = vector.multi_reduction <add>, %35, %cst_18 [1] : vector<8x32xf32> to vector<8xf32>
    %37 = vector.shape_cast %36 : vector<8xf32> to vector<8x1xf32>
    %cst_19 = arith.constant 1.000000e-24 : f32
    %38 = vector.broadcast %cst_19 : f32 to vector<8x1xf32>
    %39 = arith.maximumf %37, %38 : vector<8x1xf32>
    %40 = math.rsqrt %39 : vector<8x1xf32>
    %41 = vector.broadcast %34 : vector<8x1xf32> to vector<8x32xf32>
    %42 = arith.mulf %1, %41 : vector<8x32xf32>
    %43 = vector.broadcast %28 : vector<1x32xf32> to vector<8x32xf32>
    %44 = arith.mulf %42, %43 : vector<8x32xf32>
    %45 = vector.broadcast %40 : vector<8x1xf32> to vector<8x32xf32>
    %46 = arith.mulf %24, %45 : vector<8x32xf32>
    %47 = vector.broadcast %28 : vector<1x32xf32> to vector<8x32xf32>
    %48 = arith.mulf %46, %47 : vector<8x32xf32>
    %c0_20 = arith.constant 0 : index
    %c0_21 = arith.constant 0 : index
    %49 = vector.load %arg5[%c0_20, %c0_21] : memref<64x32xf32, #tpu.memory_space<vmem>>, vector<32x32xf32>
    %cst_22 = arith.constant dense<0.000000e+00> : vector<8x32xf32>
    %50 = tpu.matmul %44, %49, %cst_22 {dimension_numbers = #tpu.dot_dimension_numbers<[1], [0], [0], [1], [0, 0, 1, 1], [], []>} : vector<8x32xf32>, vector<32x32xf32>, vector<8x32xf32> -> vector<8x32xf32>
    %c32 = arith.constant 32 : index
    %c0_23 = arith.constant 0 : index
    %51 = vector.load %arg5[%c32, %c0_23] : memref<64x32xf32, #tpu.memory_space<vmem>>, vector<32x32xf32>
    %cst_24 = arith.constant dense<0.000000e+00> : vector<8x32xf32>
    %52 = tpu.matmul %48, %51, %cst_24 {dimension_numbers = #tpu.dot_dimension_numbers<[1], [0], [0], [1], [0, 0, 1, 1], [], []>} : vector<8x32xf32>, vector<32x32xf32>, vector<8x32xf32> -> vector<8x32xf32>
    %53 = arith.addf %50, %52 : vector<8x32xf32>
    %c0_25 = arith.constant 0 : index
    %c0_26 = arith.constant 0 : index
    %54 = vector.load %arg6[%c0_25, %c0_26] : memref<1x32xf32, #tpu.memory_space<vmem>>, vector<1x32xf32>
    %55 = vector.broadcast %54 : vector<1x32xf32> to vector<8x32xf32>
    %56 = arith.addf %53, %55 : vector<8x32xf32>
    %c0_27 = arith.constant 0 : index
    %c0_28 = arith.constant 0 : index
    %c0_29 = arith.constant 0 : index
    %57 = vector.load %arg7[%c0_27, %c0_28, %c0_29] : memref<1x8x32xf32, #tpu.memory_space<vmem>>, vector<1x8x32xf32>
    %58 = vector.shape_cast %57 : vector<1x8x32xf32> to vector<8x32xf32>
    %59 = vector.shape_cast %56 : vector<8x32xf32> to vector<1x8x32xf32>
    tpu.vector_store %arg7[%c0_27, %c0_28, %c0_29], %59 {strides = array<i32>} : memref<1x8x32xf32, #tpu.memory_space<vmem>>, vector<1x8x32xf32>,
    return
  }
  func.func @transform_0(%arg0: i32, %arg1: i32) -> (i32, i32, i32) {
    %c0_i32 = arith.constant 0 : i32
    %c0_i32_0 = arith.constant 0 : i32
    return %arg0, %arg1, %c0_i32 : i32, i32, i32
  }
  func.func @transform_1(%arg0: i32, %arg1: i32) -> (i32, i32, i32) {
    %c0_i32 = arith.constant 0 : i32
    %c0_i32_0 = arith.constant 0 : i32
    return %arg0, %arg1, %c0_i32 : i32, i32, i32
  }
  func.func @transform_2(%arg0: i32, %arg1: i32) -> (i32, i32) {
    %c0_i32 = arith.constant 0 : i32
    %c0_i32_0 = arith.constant 0 : i32
    %c0_i32_1 = arith.constant 0 : i32
    return %c0_i32, %c0_i32_0 : i32, i32
  }
  func.func @transform_3(%arg0: i32, %arg1: i32) -> (i32, i32) {
    %c0_i32 = arith.constant 0 : i32
    %c0_i32_0 = arith.constant 0 : i32
    %c0_i32_1 = arith.constant 0 : i32
    return %c0_i32, %c0_i32_0 : i32, i32
  }
  func.func @transform_4(%arg0: i32, %arg1: i32) -> (i32, i32) {
    %c0_i32 = arith.constant 0 : i32
    %c0_i32_0 = arith.constant 0 : i32
    %c0_i32_1 = arith.constant 0 : i32
    return %c0_i32, %c0_i32_0 : i32, i32
  }
  func.func @transform_5(%arg0: i32, %arg1: i32) -> (i32, i32, i32) {
    %c0_i32 = arith.constant 0 : i32
    %c0_i32_0 = arith.constant 0 : i32
    return %arg0, %arg1, %c0_i32 : i32, i32, i32
  }
}

</mosaic_0001>

<bundles_post_ra>
// kernel: tpu_custom_call.1
= control target key start
LH: loop header
LB: loop body
LE: loop exit
PB: predicated region body
PF: predicated region fallthrough
CT: control target
= control target key end

     0   :  { %10 = vsyncpa [#allocation4], 0  ;;  %s987_s0 = inlined_call_operand.vmem [shape: f32[2,8,32], index: 0, kind: input, shape index: {}]   ;;  %s988_s1 = inlined_call_operand.vmem [shape: f32[2,8,32], index: 1, kind: input, shape index: {}]   ;;  %s989_s2 = inlined_call_operand.vmem [shape: f32[1,32], index: 2, kind: input, shape index: {}]   ;;  %s990_s3 = inlined_call_operand.vmem [shape: f32[64,32], index: 3, kind: input, shape index: {}]   ;;  %s991_s4 = inlined_call_operand.vmem [shape: f32[1,32], index: 4, kind: input, shape index: {}]   ;;  %s992_s5 = inlined_call_operand.hbm [shape: f32[2,8,32], index: 5, kind: output, shape index: {}]  }
   0x1   :  { %12 = vsyncpa [#allocation4 + $0x1], 0  ;;  %s837_s18 = smov 0   ;;  %s839_s19 = smov 0  }
   0x2   :  { %s841_s20 = smov 0   ;;  %s843_s21 = smov 0  }
   0x3   :  { %s845_s22 = smov 0   ;;  %s847_s23 = smov 0  }
   0x4 LB: > { %s596_s24 = sadd.s32 4294967295, %s800_s23   ;;  %s597_s25 = sadd.s32 4294967294, %s800_s23   ;;  %s800_s23 = sphi %s847_s23, %s18_s23   ;;  %s796_s22 = sphi %s845_s22, %s999_s22   ;;  %s792_s21 = sphi %s843_s21, %s998_s21   ;;  %s788_s20 = sphi %s841_s20, %s997_s20   ;;  %s784_s19 = sphi %s839_s19, %s996_s19   ;;  %s780_s18 = sphi %s837_s18, %s995_s18  }
   0x5   : > { %s30_s26 = sadd.s32 1, %s796_s22  ;;  %s158_s27 = sadd.s32 1, %s788_s20 }
   0x6   : > { %p32_p0 = scmp.ge.s32.totalorder %s30_s26, 2  ;;  %p168_p1 = scmp.ne.s32.totalorder %s788_s20, %s784_s19 }
   0x7   : > { %p169_p2 = scmp.eq.s32.totalorder %s596_s24, 1  ;;  %p174_p3 = scmp.ne.s32.totalorder %s784_s19, %s780_s18 }
   0x8   : > { %s1001_s26 = smov (%p32_p0, %s30_s26), 0  ;;  %p175_p5 = scmp.eq.s32.totalorder %s597_s25, 1 }
   0x9   : > { %p877_p4 = por %p169_p2, %p168_p1  ;;  %s153_s29 = ssub.s32 %s796_s22, %s1001_s26 }
   0xa   : > { %p600_p6 = scmp.ge.s32.totalorder %s800_s23, 1  ;;  %p156_p7 = scmp.eq.s32.totalorder %s153_s29, 0 }
   0xb   : > { %p884_p8 = por %p175_p5, %p174_p3  ;;  %p222_p9 = scmp.lt.s32.totalorder %s800_s23, 3 }
   0xc   : > { %s890_s6 = scalar_select %p156_p7, %s788_s20, %s158_s27  }
   0xd   : > { %p223_p10 = pnand %p600_p6, %p222_p9 }
   0xe   : > { %v282_v0 = vlaneseq (!%p223_p10)  ;;  %p259_p11 = scmp.lt.s32.totalorder (!%p223_p10), %s792_s21, 1  ;;  %v802_v1 = vmov (!%p223_p10), 0   ;;  %vm279_vm0 = vcmask (!%p223_p10), 253952   ;;  %v803_v3 = vmov (!%p223_p10), 0.0   ;;  %v332_v20 = vld [vmem:[%s990_s3] sm:$0xff] (!%p223_p10)  ;;  %v333_v21 = vld [vmem:[%s990_s3 + $0x8] sm:$0xff] (!%p223_p10) }
   0xf   : > { %226 = sbr.rel (%p223_p10) target bundleno = 545 (0x221), region = 40  ;;  %717 = vset.pattern.permute.xlu0 (!%p223_p10), %v802_v1  ;;  %280 = vst.msk [vmem:[#allocation2] sm:$0x1] (!%p223_p10), %vm279_vm0, %v803_v3  ;;  %vm310_vm2 = vcmask (!%p223_p10), 261120   ;;  %v336_v22 = vld [vmem:[%s990_s3 + $0x20] sm:$0xff] (!%p223_p10)  ;;  %v804_v23 = vmov (!%p223_p10), 0.0|0.0   ;;  %v653_v24 = vpack.c.bf16 (!%p223_p10), %v333_v21, %v332_v20 }
  0x10   : > { %v283_v2 = vshrl.u32 (!%p223_p10), %v282_v0, 7  ;;  %652 = vmatprep.subr.bf16.mxu1 (!%p223_p10), %v804_v23  ;;  %646 = vmatprep.subr.bf16.mxu0 (!%p223_p10), %v804_v23  ;;  %v337_v25 = vld [vmem:[%s990_s3 + $0x28] sm:$0xff] (!%p223_p10)  ;;  %v334_v26 = vld [vmem:[%s990_s3 + $0x10] sm:$0xff] (!%p223_p10)  ;;  %v335_v27 = vld [vmem:[%s990_s3 + $0x18] sm:$0xff] (!%p223_p10)  ;;  %vm805_vm5 = vmmov (!%p223_p10), 0   ;;  %s256_s24 = sand.u32 (!%p223_p10), 1, %s784_s19  }
  0x11   : > { %v647_v28 = vpack.c.bf16 (!%p223_p10), %v337_v25, %v336_v22  ;;  %v338_v29 = vld [vmem:[%s990_s3 + $0x30] sm:$0xff] (!%p223_p10)  ;;  %v339_v30 = vld [vmem:[%s990_s3 + $0x38] sm:$0xff] (!%p223_p10)  ;;  %643 = vmatprep.mubr.msk.f32.mxu1 (!%p223_p10), %vm805_vm5, %v803_v3  ;;  %632 = vmatprep.mubr.msk.f32.mxu0 (!%p223_p10), %vm805_vm5, %v803_v3  ;;  %v656_v31 = vpack.c.bf16 (!%p223_p10), %v335_v27, %v334_v26  ;;  %v606_v36 = vld [vmem:[%s989_s2] ss:$0 sm:$0xff] (!%p223_p10)  ;;  %s601_s25 = sshll.u32 (!%p223_p10), %s256_s24, 3  ;;  %s496_s13 = scalar_lea.sflag (!%p223_p10), [#allocation4], %s256_s24 }
  0x12   : > { %v286_v4 = vrot.slane (!%p223_p10), %v283_v2, 7  ;;  %v604_v5 = vadd.s32 (!%p223_p10), 4294967295, %v283_v2  ;;  %vm295_vm3 = vcmp.eq.s32.totalorder (!%p223_p10), %v283_v2, 0  ;;  %654 = vmatpush3.bf16.msra.mxu1 (!%p223_p10), %v653_v24  ;;  %v650_v32 = vpack.c.bf16 (!%p223_p10), %v339_v30, %v338_v29  ;;  %v609_v47 = vld [vmem:[%s991_s4] ss:$0 sm:$0xff] (!%p223_p10) }
  0x13   : > { %648 = vmatpush3.bf16.msra.mxu0 (!%p223_p10), %v647_v28  ;;  %655 = vmatprep.subr.bf16.mxu1 (!%p223_p10), %v804_v23 }
  0x14   : > { %vm288_vm1 = vcmp.eq.s32.totalorder (!%p223_p10), %v286_v4, %v604_v5  ;;  %649 = vmatprep.subr.bf16.mxu0 (!%p223_p10), %v804_v23 }
  0x15   : > { %v289_v6 = vsel (!%p223_p10), %vm288_vm1, 1, %v802_v1 }
  0x16   : > { %s260_s7 = scalar_select %p259_p11, %s792_s21, 1  ;;  %291 = vperm.xlu0 %717, %v289_v6   ;;  %v605_v8 = vld [vmem:[#allocation2] ss:$0 sm:$0xff]  ;;  %657 = vmatpush3.bf16.msra.mxu1 %v656_v31 }
  0x17   : > { %651 = vmatpush3.bf16.msra.mxu0 %v650_v32 }
  0x18   : > { %s602_s8 = sshll.u32 %s260_s7, 3  ;;  %s611_s7 = sshll.u32 %s792_s21, 7 }
  0x19   : > { %s272_s11 = scalar_lea.vmem %s988_s1, %s602_s8  ;;  %s265_s14 = scalar_lea.vmem %s987_s0, %s602_s8 }
  0x1a   : > { %v305_v7 = vld [vmem:[%s272_s11 + $0x7] sm:$0x1]  ;;  %s258_s8 = scalar_lea.vmem [#allocation3], %s601_s25  ;;  %s939_s12 = scalar_lea.hbm %s992_s5, %s611_s7 }
  0x1b   : > { %307 = vst.msk [vmem:[#allocation2] sm:$0x1] %vm279_vm0, %v305_v7  ;;  %v273_v9 = vld [vmem:[%s265_s14] sm:$0xff]  ;;  %s510_s9 = sshll.u32 %s258_s8, 4  ;;  %s806_s21 = smov [#allocation3]   ;;  %s941_s9 = int_to_ptr.vmem [resolvable:$true] %s510_s9 }
  0x1c   : > { %v309_v10 = vmul.f32 %v273_v9, %v273_v9  ;;  %v274_v12 = vld [vmem:[%s272_s11] sm:$0xff]  ;;  %s722_s14 = scalar_lea.vmem %s941_s9, 128  ;;  %s726_s15 = sshll.u32 %s806_s21, 4  ;;  %s727_s15 = int_to_ptr.vmem [resolvable:$false] %s726_s15 }
  0x1d   : > { %v284_v13 = vrot.slane %v274_v12, 7  ;;  %v285_v14 = vrot.slane %v274_v12, 1  ;;  %p723_p12 = scmp.ne.s32.totalorder %s941_s9, %s722_s14  ;;  %s728_s16 = scalar_lea.vmem %s727_s15, 256 }
  0x1e   : > { %v311_v11 = vsel %vm310_vm2, %v309_v10, 0.0  ;;  %p729_p1 = scmp.lt.s32.totalorder %s941_s9, %s727_s15  ;;  %p730_p2 = scmp.lt.s32.totalorder %s728_s16, %s722_s14 }
  0x1f   : > { %p724_p13 = pnand %p723_p12, %p877_p4 }
  0x20   : > { %p731_p3 = por %p730_p2, %p729_p1 }
  0x21   : > { %p725_p0 = pneg %p724_p13 }
  0x23   : > { %p732_p5 = pnand %p731_p3, %p725_p0 }
  0x35   : > { %312 = vadd.xlane.f32.xlu0 %v311_v11 }
  0x95   : > { %v292_v15 = vpop.permute.xlu0 %291 }
  0x96   : > { %vm293_vm4 = vcmp.eq.s32.totalorder %v292_v15, 1 }
  0x97   : > { %v294_v16 = vsel %vm293_vm4, %v284_v13, %v285_v14 }
  0x98   : > { %v304_v17 = vsel %vm295_vm3, %v605_v8, %v294_v16 }
  0x99   : > { %v316_v18 = vmul.f32 %v304_v17, %v304_v17 }
  0x9b   : > { %v317_v19 = vsel %vm310_vm2, %v316_v18, 0.0 }
  0x9c   : > { %318 = vadd.xlane.f32.xlu1 %v317_v19 }
  0xc2   : > { %v313_v33 = vpop.xlane.xlu0 %312 }
  0xc3   : > { %v314_v34 = vmax.f32 %v313_v33, 1e-24 }
  0xc5   : > { %718 = vrsqrt.f32 %v314_v34 }
  0xcf   : > { %v719_v35 = vpop.eup %718 }
  0xd0   : > { %v322_v37 = vmul.f32 %v719_v35, %v273_v9 }
  0xd2   : > { %v329_v38 = vmul.f32 %v606_v36, %v322_v37 }
  0xd4   : > { %644 = vmatmul.mubr.msk.f32.vlgmr.msra.gmra.mrb[0].mxu1 %vm310_vm2, %v329_v38 }
 0x129   : > { %v319_v39 = vpop.xlane.xlu1 %318 }
 0x12a   : > { %v320_v40 = vmax.f32 %v319_v39, 1e-24 }
 0x12c   : > { %720 = vrsqrt.f32 %v320_v40 }
 0x136   : > { %v721_v41 = vpop.eup %720 }
 0x137   : > { %v330_v42 = vmul.f32 %v721_v41, %v304_v17 }
 0x139   : > { %v331_v43 = vmul.f32 %v606_v36, %v330_v42 }
 0x13b   : > { %633 = vmatmul.mubr.msk.f32.vlgmr.msra.gmra.mrb[0].mxu0 %vm310_vm2, %v331_v43 }
 0x1a7   : > { %v482_v44 = vpop.f32.mrb[0].mxu1 }
 0x1a8   : > { %v645_v45 = vpop.f32.mrb[1].mxu1 }
 0x20e   : > { %v409_v46 = vpop.f32.mrb[0].mxu0 }
 0x20f   : > { %v483_v48 = vadd.f32 %v482_v44, %v409_v46  ;;  %v634_v49 = vpop.f32.mrb[1].mxu0 }
 0x211   : > { %v493_v50 = vadd.f32 %v609_v47, %v483_v48 }
 0x213   : > { %494 = vst.msk [vmem:[%s258_s8] sm:$0xff] %vm310_vm2, %v493_v50 }
 0x214   : > { %735 = shalt.err (!%p732_p5)
}
 0x215   : > { %s736_s17 = scalar_lea.hbm %s939_s12, 128  ;;  %s740_s27 = scalar_lea.hbm %s992_s5, 256 }
 0x216   : > { %p737_p6 = scmp.ne.s32.totalorder %s939_s12, %s736_s17  ;;  %p741_p10 = scmp.lt.u32.totalorder %s939_s12, %s992_s5 }
 0x217   : > { %p742_p11 = scmp.lt.u32.totalorder %s740_s27, %s736_s17  ;;  %p744_p13 = scmp.lt.u32.totalorder %s736_s17, %s939_s12 }
 0x218   : > { %p738_p7 = pnand %p737_p6, %p877_p4 }
 0x219   : > { %p743_p12 = por %p742_p11, %p741_p10 }
 0x21a   : > { %p739_p9 = pneg %p738_p7 }
 0x21b   : > { %p745_p0 = por %p744_p13, %p743_p12 }
 0x21d   : > { %p746_p1 = pnand %p745_p0, %p739_p9 }
 0x21f   : > { %749 = shalt.err (!%p746_p1)
}
 0x220   : > { %658 = dma.vmem_to_hbm [thread:$0]  (%p877_p4), %s941_s9, 128, %s939_s12, %s496_s13  }
 0x221 PF: > { %p664_p2 = scmp.ge.s32.totalorder %s800_s23, 2  ;;  %s522_s8 = sand.u32 1, %s780_s18  }
 0x222   : > { %s523_s10 = scalar_lea.sflag [#allocation4], %s522_s8 }
 0x223   : > { %p661_p3 = pnand %p664_p2, %p884_p8 }
 0x225   : > { %775 = dma.done.wait (!%p661_p3), %s523_s10, 128  }
 0x226   : > { %777 = vsyncadd (!%p661_p3), %s523_s10, 4294967168  ;;  %s18_s23 = sadd.s32 1, %s800_s23   ;;  %s995_s18 = smov %s784_s19 }
 0x227   : > { %p15_p5 = scmp.ge.s32.totalorder %s18_s23, 4   ;;  %s996_s19 = smov %s788_s20 }
 0x228   : > { %s997_s20 = smov %s890_s6  ;;  %s998_s21 = smov %s796_s22 }
 0x229   : > { %s999_s22 = smov %s1001_s26  ;;  %17 = sbr.rel (!%p15_p5) target bundleno = 4 (0x4), region = 82 }
 0x230   :  { %528 = vsyncpa [#allocation4], 1 }
 0x231   :  { %530 = vsyncpa [#allocation4 + $0x1], 1 }

</bundles_post_ra>
